<compile_context>
chip_gen: v7x
topology: tpu7x:2x2x1
jax: 0.10.0
libtpu: 0.0.40
codegen_flags: <defaults>
</compile_context>

<pallas_src>
import functools

import jax
import jax.numpy as jnp
from jax import lax
from jax.experimental import pallas as pl
from jax.experimental.pallas import tpu as pltpu

EPS = 1e-5
LANES = 128
N_TAPS = 9  # 3x3 kernel


def _round_up(x, m):
    return (x + m - 1) // m * m


def _make_conv_stats_kernel(tm, cpad, m_valid):
    """Pass 1: 9-tap conv + bias; also emits per-tile per-channel sum/sumsq."""

    def kernel(*refs):
        tap_refs = refs[:N_TAPS]                       # 9 x [tm, Cin] bf16
        w_ref = refs[N_TAPS]                           # [9, Cin, cpad] bf16
        b_ref = refs[N_TAPS + 1]                       # [1, cpad] f32
        y_ref = refs[N_TAPS + 2]                       # [tm, cpad] f32 out
        stats_ref = refs[N_TAPS + 3]                   # [1, 2, cpad] f32 out

        acc = jnp.zeros((tm, cpad), jnp.float32)
        for t in range(N_TAPS):                        # K = Cin per matmul
            acc += jnp.dot(tap_refs[t][...], w_ref[t],
                           preferred_element_type=jnp.float32)
        y = acc + b_ref[...]                           # conv + bias, f32
        y_ref[...] = y

        # Rows beyond the true M are zero-padding; mask them out of the BN
        # statistics (only needed when M does not divide evenly into tiles).
        if m_valid % tm == 0:
            yv = y
        else:
            rows = lax.broadcasted_iota(jnp.int32, (tm, cpad), 0)
            valid = (rows + pl.program_id(0) * tm) < m_valid
            yv = jnp.where(valid, y, 0.0)

        s1 = jnp.sum(yv, axis=0, keepdims=True)        # [1, cpad]
        s2 = jnp.sum(yv * yv, axis=0, keepdims=True)   # [1, cpad]
        stats_ref[...] = jnp.concatenate([s1, s2], axis=0).reshape(1, 2, cpad)

    return kernel


def _bn_relu_kernel(y_ref, scale_ref, shift_ref, o_ref):
    """Pass 2: y * scale + shift, ReLU (scale/shift fold mean/var/gamma/beta)."""
    o_ref[...] = jnp.maximum(y_ref[...] * scale_ref[...] + shift_ref[...], 0.0)


def down_conv_block(x_nchw, w_oihw, bias, gamma, beta, *, tm=512,
                    vmem_limit_bytes=48 * 1024 * 1024):
    """Forward pass of DownConvBlock. [N, Cin, H, W] -> [N, Cout, ceil(H/2), ceil(W/2)]."""
    n, cin, h, w = x_nchw.shape
    cout = w_oihw.shape[0]
    ho, wo = (h + 1) // 2, (w + 1) // 2
    m = n * ho * wo
    cpad = _round_up(cout, LANES)                      # lane-dense output width

    # M tile: multiple of 8 sublanes, capped to (padded) M. 512-2048 rows is the
    # sweet spot at real sizes; on v7x keep (taps + y tiles) x 2 buffers < ~48MiB.
    tm = max(8, min(_round_up(tm, 8), _round_up(m, 8)))
    nm = (m + tm - 1) // tm
    mpad = nm * tm

    # ---- wrapper-side layout prep (no [M, 9*Cin] im2col concatenate) ----
    x_nhwc = jnp.transpose(x_nchw, (0, 2, 3, 1)).astype(jnp.bfloat16)
    xp = jnp.pad(x_nhwc, ((0, 0), (1, 1), (1, 1), (0, 0)))

    taps = []
    for kh in range(3):
        for kw in range(3):
            sl = xp[:, kh:kh + 2 * ho:2, kw:kw + 2 * wo:2, :]   # [N, Ho, Wo, Cin]
            sl = sl.reshape(m, cin)
            taps.append(jnp.pad(sl, ((0, mpad - m), (0, 0))))

    # weight: OIHW -> [kh*3+kw, Cin, Cout_pad] bf16 (matches tap ordering)
    w_taps = jnp.transpose(w_oihw, (2, 3, 1, 0)).reshape(N_TAPS, cin, cout)
    w_taps = jnp.pad(w_taps, ((0, 0), (0, 0), (0, cpad - cout))).astype(jnp.bfloat16)
    bias_p = jnp.pad(bias, (0, cpad - cout)).astype(jnp.float32).reshape(1, cpad)

    cparams = pltpu.CompilerParams(
        dimension_semantics=("parallel",),
        vmem_limit_bytes=vmem_limit_bytes,
    )

    tap_spec = pl.BlockSpec((tm, cin), lambda i: (i, 0))
    row_spec = pl.BlockSpec((tm, cpad), lambda i: (i, 0))
    vec_spec = pl.BlockSpec((1, cpad), lambda i: (0, 0))

    # ---- pass 1: conv + bias, per-tile BN partial sums ----
    y_conv, stats = pl.pallas_call(
        _make_conv_stats_kernel(tm, cpad, m),
        grid=(nm,),
        in_specs=[tap_spec] * N_TAPS + [
            pl.BlockSpec((N_TAPS, cin, cpad), lambda i: (0, 0, 0)),  # weights
            vec_spec,                                                # bias
        ],
        out_specs=[
            row_spec,                                       # conv output y
            pl.BlockSpec((1, 2, cpad), lambda i: (i, 0, 0)),  # per-tile sum/sumsq
        ],
        out_shape=[
            jax.ShapeDtypeStruct((mpad, cpad), jnp.float32),
            jax.ShapeDtypeStruct((nm, 2, cpad), jnp.float32),
        ],
        compiler_params=cparams,
    )(*taps, w_taps, bias_p)

    # ---- finalize BatchNorm batch statistics (tiny per-channel reduction) ----
    totals = jnp.sum(stats, axis=0)                     # [2, cpad]
    mean = totals[0] / m
    var = jnp.maximum(totals[1] / m - mean * mean, 0.0)  # biased (training mode)
    gamma_p = jnp.pad(gamma, (0, cpad - cout)).astype(jnp.float32)
    beta_p = jnp.pad(beta, (0, cpad - cout)).astype(jnp.float32)
    scale_v = gamma_p * lax.rsqrt(var + EPS)
    shift_v = beta_p - mean * scale_v
    scale = scale_v.reshape(1, cpad)
    shift = shift_v.reshape(1, cpad)

    # ---- pass 2: normalize + ReLU, tiled & lane-dense ----
    out_pad = pl.pallas_call(
        _bn_relu_kernel,
        grid=(nm,),
        in_specs=[row_spec, vec_spec, vec_spec],
        out_specs=row_spec,
        out_shape=jax.ShapeDtypeStruct((mpad, cpad), jnp.float32),
        compiler_params=cparams,
    )(y_conv, scale, shift)

    out = out_pad[:m, :cout].reshape(n, ho, wo, cout)
    return jnp.transpose(out, (0, 3, 1, 2))             # back to NCHW


def reference(x_nchw, w_oihw, bias, gamma, beta):
    """bf16-operand / f32-accumulation reference (matches the kernel's MXU math)."""
    y = lax.conv_general_dilated(
        x_nchw.astype(jnp.bfloat16), w_oihw.astype(jnp.bfloat16),
        window_strides=(2, 2), padding=((1, 1), (1, 1)),
        dimension_numbers=("NCHW", "OIHW", "NCHW"),
        preferred_element_type=jnp.float32)
    y = y + bias[None, :, None, None]
    mean = jnp.mean(y, axis=(0, 2, 3), keepdims=True)
    var = jnp.var(y, axis=(0, 2, 3), keepdims=True)      # biased, BN training mode
    y = (y - mean) * lax.rsqrt(var + EPS)
    y = y * gamma[None, :, None, None] + beta[None, :, None, None]
    return jnp.maximum(y, 0.0)


if __name__ == "__main__":
    key = jax.random.PRNGKey(0)
    k_x, k_w, k_b, k_g, k_beta = jax.random.split(key, 5)

    N, Cin, H, W = 2, 4, 16, 16
    Cout = 8

    x = jax.random.normal(k_x, (N, Cin, H, W), dtype=jnp.float32)
    w = jax.random.normal(k_w, (Cout, Cin, 3, 3), dtype=jnp.float32) * 0.1
    b = jax.random.normal(k_b, (Cout,), dtype=jnp.float32) * 0.1
    gamma = 1.0 + 0.1 * jax.random.normal(k_g, (Cout,), dtype=jnp.float32)
    beta = 0.1 * jax.random.normal(k_beta, (Cout,), dtype=jnp.float32)

    # tm=48 at toy scale forces a multi-tile grid, ragged-M masking, and the
    # cross-tile BN reduction; at real sizes use the 512-2048 row default.
    fwd = jax.jit(functools.partial(down_conv_block, tm=48))
    out = jax.block_until_ready(fwd(x, w, b, gamma, beta))

    ref = reference(x, w, b, gamma, beta)
    assert out.shape == (N, Cout, H // 2, W // 2)
    # bf16 operands with exact f32 accumulation: kernel-vs-reference differences
    # are accumulation-order only, well inside 1e-3.
    assert jnp.allclose(out, ref, atol=1e-3, rtol=1e-3), "mismatch vs reference"

    print("KERNEL_OK")
</pallas_src>

<mosaic_0001>
module attributes {stable_mosaic.version = 11 : i64} {
  func.func @kernel(%arg0: i32, %arg1: memref<48x4xbf16, #tpu.memory_space<vmem>>, %arg2: memref<48x4xbf16, #tpu.memory_space<vmem>>, %arg3: memref<48x4xbf16, #tpu.memory_space<vmem>>, %arg4: memref<48x4xbf16, #tpu.memory_space<vmem>>, %arg5: memref<48x4xbf16, #tpu.memory_space<vmem>>, %arg6: memref<48x4xbf16, #tpu.memory_space<vmem>>, %arg7: memref<48x4xbf16, #tpu.memory_space<vmem>>, %arg8: memref<48x4xbf16, #tpu.memory_space<vmem>>, %arg9: memref<48x4xbf16, #tpu.memory_space<vmem>>, %arg10: memref<9x4x128xbf16, #tpu.memory_space<vmem>>, %arg11: memref<1x128xf32, #tpu.memory_space<vmem>>, %arg12: memref<48x128xf32, #tpu.memory_space<vmem>>, %arg13: memref<1x2x128xf32, #tpu.memory_space<vmem>>) attributes {dimension_semantics = [#tpu.dimension_semantics<parallel>], iteration_bounds = array<i64: 3>, scalar_prefetch = 0 : i64, scratch_operands = 0 : i64, tpu.core_type = #tpu.core_type<tc>, window_params = [{transform_indices = @transform_0, window_bounds = array<i64: 48, 4>}, {transform_indices = @transform_1, window_bounds = array<i64: 48, 4>}, {transform_indices = @transform_2, window_bounds = array<i64: 48, 4>}, {transform_indices = @transform_3, window_bounds = array<i64: 48, 4>}, {transform_indices = @transform_4, window_bounds = array<i64: 48, 4>}, {transform_indices = @transform_5, window_bounds = array<i64: 48, 4>}, {transform_indices = @transform_6, window_bounds = array<i64: 48, 4>}, {transform_indices = @transform_7, window_bounds = array<i64: 48, 4>}, {transform_indices = @transform_8, window_bounds = array<i64: 48, 4>}, {pipeline_mode = #tpu.pipeline_mode<synchronous>, transform_indices = @transform_9, window_bounds = array<i64: 9, 4, 128>}, {pipeline_mode = #tpu.pipeline_mode<synchronous>, transform_indices = @transform_10, window_bounds = array<i64: 1, 128>}, {transform_indices = @transform_11, window_bounds = array<i64: 48, 128>}, {transform_indices = @transform_12, window_bounds = array<i64: 1, 2, 128>}]} {
    %cst = arith.constant 0.000000e+00 : f32
    %0 = vector.broadcast %cst : f32 to vector<48x128xf32>
    %c0 = arith.constant 0 : index
    %c0_0 = arith.constant 0 : index
    %1 = vector.load %arg1[%c0, %c0_0] : memref<48x4xbf16, #tpu.memory_space<vmem>>, vector<48x4xbf16>
    %c0_1 = arith.constant 0 : index
    %c0_2 = arith.constant 0 : index
    %c0_3 = arith.constant 0 : index
    %2 = vector.load %arg10[%c0_1, %c0_2, %c0_3] : memref<9x4x128xbf16, #tpu.memory_space<vmem>>, vector<1x4x128xbf16>
    %3 = vector.shape_cast %2 : vector<1x4x128xbf16> to vector<4x128xbf16>
    %cst_4 = arith.constant dense<0.000000e+00> : vector<48x128xf32>
    %4 = tpu.matmul %1, %3, %cst_4 {dimension_numbers = #tpu.dot_dimension_numbers<[1], [0], [0], [1], [0, 0, 1, 1], [], []>} : vector<48x4xbf16>, vector<4x128xbf16>, vector<48x128xf32> -> vector<48x128xf32>
    %5 = arith.addf %0, %4 : vector<48x128xf32>
    %c0_5 = arith.constant 0 : index
    %c0_6 = arith.constant 0 : index
    %6 = vector.load %arg2[%c0_5, %c0_6] : memref<48x4xbf16, #tpu.memory_space<vmem>>, vector<48x4xbf16>
    %c1 = arith.constant 1 : index
    %c0_7 = arith.constant 0 : index
    %c0_8 = arith.constant 0 : index
    %7 = vector.load %arg10[%c1, %c0_7, %c0_8] : memref<9x4x128xbf16, #tpu.memory_space<vmem>>, vector<1x4x128xbf16>
    %8 = vector.shape_cast %7 : vector<1x4x128xbf16> to vector<4x128xbf16>
    %cst_9 = arith.constant dense<0.000000e+00> : vector<48x128xf32>
    %9 = tpu.matmul %6, %8, %cst_9 {dimension_numbers = #tpu.dot_dimension_numbers<[1], [0], [0], [1], [0, 0, 1, 1], [], []>} : vector<48x4xbf16>, vector<4x128xbf16>, vector<48x128xf32> -> vector<48x128xf32>
    %10 = arith.addf %5, %9 : vector<48x128xf32>
    %c0_10 = arith.constant 0 : index
    %c0_11 = arith.constant 0 : index
    %11 = vector.load %arg3[%c0_10, %c0_11] : memref<48x4xbf16, #tpu.memory_space<vmem>>, vector<48x4xbf16>
    %c2 = arith.constant 2 : index
    %c0_12 = arith.constant 0 : index
    %c0_13 = arith.constant 0 : index
    %12 = vector.load %arg10[%c2, %c0_12, %c0_13] : memref<9x4x128xbf16, #tpu.memory_space<vmem>>, vector<1x4x128xbf16>
    %13 = vector.shape_cast %12 : vector<1x4x128xbf16> to vector<4x128xbf16>
    %cst_14 = arith.constant dense<0.000000e+00> : vector<48x128xf32>
    %14 = tpu.matmul %11, %13, %cst_14 {dimension_numbers = #tpu.dot_dimension_numbers<[1], [0], [0], [1], [0, 0, 1, 1], [], []>} : vector<48x4xbf16>, vector<4x128xbf16>, vector<48x128xf32> -> vector<48x128xf32>
    %15 = arith.addf %10, %14 : vector<48x128xf32>
    %c0_15 = arith.constant 0 : index
    %c0_16 = arith.constant 0 : index
    %16 = vector.load %arg4[%c0_15, %c0_16] : memref<48x4xbf16, #tpu.memory_space<vmem>>, vector<48x4xbf16>
    %c3 = arith.constant 3 : index
    %c0_17 = arith.constant 0 : index
    %c0_18 = arith.constant 0 : index
    %17 = vector.load %arg10[%c3, %c0_17, %c0_18] : memref<9x4x128xbf16, #tpu.memory_space<vmem>>, vector<1x4x128xbf16>
    %18 = vector.shape_cast %17 : vector<1x4x128xbf16> to vector<4x128xbf16>
    %cst_19 = arith.constant dense<0.000000e+00> : vector<48x128xf32>
    %19 = tpu.matmul %16, %18, %cst_19 {dimension_numbers = #tpu.dot_dimension_numbers<[1], [0], [0], [1], [0, 0, 1, 1], [], []>} : vector<48x4xbf16>, vector<4x128xbf16>, vector<48x128xf32> -> vector<48x128xf32>
    %20 = arith.addf %15, %19 : vector<48x128xf32>
    %c0_20 = arith.constant 0 : index
    %c0_21 = arith.constant 0 : index
    %21 = vector.load %arg5[%c0_20, %c0_21] : memref<48x4xbf16, #tpu.memory_space<vmem>>, vector<48x4xbf16>
    %c4 = arith.constant 4 : index
    %c0_22 = arith.constant 0 : index
    %c0_23 = arith.constant 0 : index
    %22 = vector.load %arg10[%c4, %c0_22, %c0_23] : memref<9x4x128xbf16, #tpu.memory_space<vmem>>, vector<1x4x128xbf16>
    %23 = vector.shape_cast %22 : vector<1x4x128xbf16> to vector<4x128xbf16>
    %cst_24 = arith.constant dense<0.000000e+00> : vector<48x128xf32>
    %24 = tpu.matmul %21, %23, %cst_24 {dimension_numbers = #tpu.dot_dimension_numbers<[1], [0], [0], [1], [0, 0, 1, 1], [], []>} : vector<48x4xbf16>, vector<4x128xbf16>, vector<48x128xf32> -> vector<48x128xf32>
    %25 = arith.addf %20, %24 : vector<48x128xf32>
    %c0_25 = arith.constant 0 : index
    %c0_26 = arith.constant 0 : index
    %26 = vector.load %arg6[%c0_25, %c0_26] : memref<48x4xbf16, #tpu.memory_space<vmem>>, vector<48x4xbf16>
    %c5 = arith.constant 5 : index
    %c0_27 = arith.constant 0 : index
    %c0_28 = arith.constant 0 : index
    %27 = vector.load %arg10[%c5, %c0_27, %c0_28] : memref<9x4x128xbf16, #tpu.memory_space<vmem>>, vector<1x4x128xbf16>
    %28 = vector.shape_cast %27 : vector<1x4x128xbf16> to vector<4x128xbf16>
    %cst_29 = arith.constant dense<0.000000e+00> : vector<48x128xf32>
    %29 = tpu.matmul %26, %28, %cst_29 {dimension_numbers = #tpu.dot_dimension_numbers<[1], [0], [0], [1], [0, 0, 1, 1], [], []>} : vector<48x4xbf16>, vector<4x128xbf16>, vector<48x128xf32> -> vector<48x128xf32>
    %30 = arith.addf %25, %29 : vector<48x128xf32>
    %c0_30 = arith.constant 0 : index
    %c0_31 = arith.constant 0 : index
    %31 = vector.load %arg7[%c0_30, %c0_31] : memref<48x4xbf16, #tpu.memory_space<vmem>>, vector<48x4xbf16>
    %c6 = arith.constant 6 : index
    %c0_32 = arith.constant 0 : index
    %c0_33 = arith.constant 0 : index
    %32 = vector.load %arg10[%c6, %c0_32, %c0_33] : memref<9x4x128xbf16, #tpu.memory_space<vmem>>, vector<1x4x128xbf16>
    %33 = vector.shape_cast %32 : vector<1x4x128xbf16> to vector<4x128xbf16>
    %cst_34 = arith.constant dense<0.000000e+00> : vector<48x128xf32>
    %34 = tpu.matmul %31, %33, %cst_34 {dimension_numbers = #tpu.dot_dimension_numbers<[1], [0], [0], [1], [0, 0, 1, 1], [], []>} : vector<48x4xbf16>, vector<4x128xbf16>, vector<48x128xf32> -> vector<48x128xf32>
    %35 = arith.addf %30, %34 : vector<48x128xf32>
    %c0_35 = arith.constant 0 : index
    %c0_36 = arith.constant 0 : index
    %36 = vector.load %arg8[%c0_35, %c0_36] : memref<48x4xbf16, #tpu.memory_space<vmem>>, vector<48x4xbf16>
    %c7 = arith.constant 7 : index
    %c0_37 = arith.constant 0 : index
    %c0_38 = arith.constant 0 : index
    %37 = vector.load %arg10[%c7, %c0_37, %c0_38] : memref<9x4x128xbf16, #tpu.memory_space<vmem>>, vector<1x4x128xbf16>
    %38 = vector.shape_cast %37 : vector<1x4x128xbf16> to vector<4x128xbf16>
    %cst_39 = arith.constant dense<0.000000e+00> : vector<48x128xf32>
    %39 = tpu.matmul %36, %38, %cst_39 {dimension_numbers = #tpu.dot_dimension_numbers<[1], [0], [0], [1], [0, 0, 1, 1], [], []>} : vector<48x4xbf16>, vector<4x128xbf16>, vector<48x128xf32> -> vector<48x128xf32>
    %40 = arith.addf %35, %39 : vector<48x128xf32>
    %c0_40 = arith.constant 0 : index
    %c0_41 = arith.constant 0 : index
    %41 = vector.load %arg9[%c0_40, %c0_41] : memref<48x4xbf16, #tpu.memory_space<vmem>>, vector<48x4xbf16>
    %c8 = arith.constant 8 : index
    %c0_42 = arith.constant 0 : index
    %c0_43 = arith.constant 0 : index
    %42 = vector.load %arg10[%c8, %c0_42, %c0_43] : memref<9x4x128xbf16, #tpu.memory_space<vmem>>, vector<1x4x128xbf16>
    %43 = vector.shape_cast %42 : vector<1x4x128xbf16> to vector<4x128xbf16>
    %cst_44 = arith.constant dense<0.000000e+00> : vector<48x128xf32>
    %44 = tpu.matmul %41, %43, %cst_44 {dimension_numbers = #tpu.dot_dimension_numbers<[1], [0], [0], [1], [0, 0, 1, 1], [], []>} : vector<48x4xbf16>, vector<4x128xbf16>, vector<48x128xf32> -> vector<48x128xf32>
    %45 = arith.addf %40, %44 : vector<48x128xf32>
    %c0_45 = arith.constant 0 : index
    %c0_46 = arith.constant 0 : index
    %46 = vector.load %arg11[%c0_45, %c0_46] : memref<1x128xf32, #tpu.memory_space<vmem>>, vector<1x128xf32>
    %47 = vector.broadcast %46 : vector<1x128xf32> to vector<48x128xf32>
    %48 = arith.addf %45, %47 : vector<48x128xf32>
    %c0_47 = arith.constant 0 : index
    %c0_48 = arith.constant 0 : index
    %49 = vector.load %arg12[%c0_47, %c0_48] : memref<48x128xf32, #tpu.memory_space<vmem>>, vector<48x128xf32>
    tpu.vector_store %arg12[%c0_47, %c0_48], %48 {strides = array<i32>} : memref<48x128xf32, #tpu.memory_space<vmem>>, vector<48x128xf32>,
    %50 = tpu.iota {dimensions = array<i32: 0>} : vector<48x128xi32>
    %c48_i32 = arith.constant 48 : i32
    %51 = arith.muli %arg0, %c48_i32 : i32
    %52 = vector.broadcast %51 : i32 to vector<48x128xi32>
    %53 = arith.addi %50, %52 : vector<48x128xi32>
    %c128_i32 = arith.constant 128 : i32
    %54 = vector.broadcast %c128_i32 : i32 to vector<48x128xi32>
    %55 = arith.cmpi slt, %53, %54 : vector<48x128xi32>
    %cst_49 = arith.constant 0.000000e+00 : f32
    %56 = vector.broadcast %cst_49 : f32 to vector<48x128xf32>
    %57 = arith.select %55, %48, %56 : vector<48x128xi1>, vector<48x128xf32>
    %cst_50 = arith.constant dense<0.000000e+00> : vector<128xf32>
    %58 = vector.multi_reduction <add>, %57, %cst_50 [0] : vector<48x128xf32> to vector<128xf32>
    %59 = vector.shape_cast %58 : vector<128xf32> to vector<1x128xf32>
    %60 = arith.mulf %57, %57 : vector<48x128xf32>
    %cst_51 = arith.constant dense<0.000000e+00> : vector<128xf32>
    %61 = vector.multi_reduction <add>, %60, %cst_51 [0] : vector<48x128xf32> to vector<128xf32>
    %62 = vector.shape_cast %61 : vector<128xf32> to vector<1x128xf32>
    %63 = tpu.concatenate %59, %62 in 0 : vector<1x128xf32>, vector<1x128xf32> -> vector<2x128xf32>
    %64 = vector.shape_cast %63 : vector<2x128xf32> to vector<1x2x128xf32>
    %c0_52 = arith.constant 0 : index
    %c0_53 = arith.constant 0 : index
    %c0_54 = arith.constant 0 : index
    %65 = vector.load %arg13[%c0_52, %c0_53, %c0_54] : memref<1x2x128xf32, #tpu.memory_space<vmem>>, vector<1x2x128xf32>
    tpu.vector_store %arg13[%c0_52, %c0_53, %c0_54], %64 {strides = array<i32>} : memref<1x2x128xf32, #tpu.memory_space<vmem>>, vector<1x2x128xf32>,
    return
  }
  func.func @transform_0(%arg0: i32) -> (i32, i32) {
    %c0_i32 = arith.constant 0 : i32
    %c0_i32_0 = arith.constant 0 : i32
    return %arg0, %c0_i32 : i32, i32
  }
  func.func @transform_1(%arg0: i32) -> (i32, i32) {
    %c0_i32 = arith.constant 0 : i32
    %c0_i32_0 = arith.constant 0 : i32
    return %arg0, %c0_i32 : i32, i32
  }
  func.func @transform_2(%arg0: i32) -> (i32, i32) {
    %c0_i32 = arith.constant 0 : i32
    %c0_i32_0 = arith.constant 0 : i32
    return %arg0, %c0_i32 : i32, i32
  }
  func.func @transform_3(%arg0: i32) -> (i32, i32) {
    %c0_i32 = arith.constant 0 : i32
    %c0_i32_0 = arith.constant 0 : i32
    return %arg0, %c0_i32 : i32, i32
  }
  func.func @transform_4(%arg0: i32) -> (i32, i32) {
    %c0_i32 = arith.constant 0 : i32
    %c0_i32_0 = arith.constant 0 : i32
    return %arg0, %c0_i32 : i32, i32
  }
  func.func @transform_5(%arg0: i32) -> (i32, i32) {
    %c0_i32 = arith.constant 0 : i32
    %c0_i32_0 = arith.constant 0 : i32
    return %arg0, %c0_i32 : i32, i32
  }
  func.func @transform_6(%arg0: i32) -> (i32, i32) {
    %c0_i32 = arith.constant 0 : i32
    %c0_i32_0 = arith.constant 0 : i32
    return %arg0, %c0_i32 : i32, i32
  }
  func.func @transform_7(%arg0: i32) -> (i32, i32) {
    %c0_i32 = arith.constant 0 : i32
    %c0_i32_0 = arith.constant 0 : i32
    return %arg0, %c0_i32 : i32, i32
  }
  func.func @transform_8(%arg0: i32) -> (i32, i32) {
    %c0_i32 = arith.constant 0 : i32
    %c0_i32_0 = arith.constant 0 : i32
    return %arg0, %c0_i32 : i32, i32
  }
  func.func @transform_9(%arg0: i32) -> (i32, i32, i32) {
    %c0_i32 = arith.constant 0 : i32
    %c0_i32_0 = arith.constant 0 : i32
    %c0_i32_1 = arith.constant 0 : i32
    %c0_i32_2 = arith.constant 0 : i32
    return %c0_i32, %c0_i32_0, %c0_i32_1 : i32, i32, i32
  }
  func.func @transform_10(%arg0: i32) -> (i32, i32) {
    %c0_i32 = arith.constant 0 : i32
    %c0_i32_0 = arith.constant 0 : i32
    %c0_i32_1 = arith.constant 0 : i32
    return %c0_i32, %c0_i32_0 : i32, i32
  }
  func.func @transform_11(%arg0: i32) -> (i32, i32) {
    %c0_i32 = arith.constant 0 : i32
    %c0_i32_0 = arith.constant 0 : i32
    return %arg0, %c0_i32 : i32, i32
  }
  func.func @transform_12(%arg0: i32) -> (i32, i32, i32) {
    %c0_i32 = arith.constant 0 : i32
    %c0_i32_0 = arith.constant 0 : i32
    %c0_i32_1 = arith.constant 0 : i32
    return %arg0, %c0_i32, %c0_i32_0 : i32, i32, i32
  }
}

module attributes {stable_mosaic.version = 11 : i64} {
  func.func @_bn_relu_kernel(%arg0: i32, %arg1: memref<48x128xf32, #tpu.memory_space<vmem>>, %arg2: memref<1x128xf32, #tpu.memory_space<vmem>>, %arg3: memref<1x128xf32, #tpu.memory_space<vmem>>, %arg4: memref<48x128xf32, #tpu.memory_space<vmem>>) attributes {dimension_semantics = [#tpu.dimension_semantics<parallel>], iteration_bounds = array<i64: 3>, scalar_prefetch = 0 : i64, scratch_operands = 0 : i64, tpu.core_type = #tpu.core_type<tc>, window_params = [{transform_indices = @transform_0, window_bounds = array<i64: 48, 128>}, {pipeline_mode = #tpu.pipeline_mode<synchronous>, transform_indices = @transform_1, window_bounds = array<i64: 1, 128>}, {pipeline_mode = #tpu.pipeline_mode<synchronous>, transform_indices = @transform_2, window_bounds = array<i64: 1, 128>}, {transform_indices = @transform_3, window_bounds = array<i64: 48, 128>}]} {
    %c0 = arith.constant 0 : index
    %c0_0 = arith.constant 0 : index
    %0 = vector.load %arg1[%c0, %c0_0] : memref<48x128xf32, #tpu.memory_space<vmem>>, vector<48x128xf32>
    %c0_1 = arith.constant 0 : index
    %c0_2 = arith.constant 0 : index
    %1 = vector.load %arg2[%c0_1, %c0_2] : memref<1x128xf32, #tpu.memory_space<vmem>>, vector<1x128xf32>
    %2 = vector.broadcast %1 : vector<1x128xf32> to vector<48x128xf32>
    %3 = arith.mulf %0, %2 : vector<48x128xf32>
    %c0_3 = arith.constant 0 : index
    %c0_4 = arith.constant 0 : index
    %4 = vector.load %arg3[%c0_3, %c0_4] : memref<1x128xf32, #tpu.memory_space<vmem>>, vector<1x128xf32>
    %5 = vector.broadcast %4 : vector<1x128xf32> to vector<48x128xf32>
    %6 = arith.addf %3, %5 : vector<48x128xf32>
    %cst = arith.constant 0.000000e+00 : f32
    %7 = vector.broadcast %cst : f32 to vector<48x128xf32>
    %8 = arith.maximumf %6, %7 : vector<48x128xf32>
    %c0_5 = arith.constant 0 : index
    %c0_6 = arith.constant 0 : index
    %9 = vector.load %arg4[%c0_5, %c0_6] : memref<48x128xf32, #tpu.memory_space<vmem>>, vector<48x128xf32>
    tpu.vector_store %arg4[%c0_5, %c0_6], %8 {strides = array<i32>} : memref<48x128xf32, #tpu.memory_space<vmem>>, vector<48x128xf32>,
    return
  }
  func.func @transform_0(%arg0: i32) -> (i32, i32) {
    %c0_i32 = arith.constant 0 : i32
    %c0_i32_0 = arith.constant 0 : i32
    return %arg0, %c0_i32 : i32, i32
  }
  func.func @transform_1(%arg0: i32) -> (i32, i32) {
    %c0_i32 = arith.constant 0 : i32
    %c0_i32_0 = arith.constant 0 : i32
    %c0_i32_1 = arith.constant 0 : i32
    return %c0_i32, %c0_i32_0 : i32, i32
  }
  func.func @transform_2(%arg0: i32) -> (i32, i32) {
    %c0_i32 = arith.constant 0 : i32
    %c0_i32_0 = arith.constant 0 : i32
    %c0_i32_1 = arith.constant 0 : i32
    return %c0_i32, %c0_i32_0 : i32, i32
  }
  func.func @transform_3(%arg0: i32) -> (i32, i32) {
    %c0_i32 = arith.constant 0 : i32
    %c0_i32_0 = arith.constant 0 : i32
    return %arg0, %c0_i32 : i32, i32
  }
}

</mosaic_0001>

<bundles_post_ra>
// kernel: down_conv_block.3
= control target key start
LH: loop header
LB: loop body
LE: loop exit
PB: predicated region body
PF: predicated region fallthrough
CT: control target
= control target key end

     0   :  { %s321_s12 = smov 0   ;;  %s344_s0 = inlined_call_operand.vmem [shape: f32[144,128], index: 0, kind: input, shape index: {}]   ;;  %s345_s1 = inlined_call_operand.vmem [shape: f32[1,128], index: 1, kind: input, shape index: {}]   ;;  %s346_s2 = inlined_call_operand.vmem [shape: f32[1,128], index: 2, kind: input, shape index: {}]   ;;  %s347_s3 = inlined_call_operand.vmem [shape: f32[144,128], index: 3, kind: output, shape index: {}]  }
   0x1 LB: > { %s274_s13 = sadd.s32 4294967295, %s299_s12   ;;  %p278_p0 = scmp.ge.s32.totalorder %s299_s12, 1  ;;  %s299_s12 = sphi %s321_s12, %s13_s12  }
   0x2   : > { %p138_p1 = scmp.lt.s32.totalorder %s299_s12, 4 }
   0x4   : > { %p139_p2 = pnand %p278_p0, %p138_p1 }
   0x5   : > { %s162_s14 = smul.u32 (!%p139_p2), 6, %s274_s13  ;;  %v281_v0 = vld [vmem:[%s345_s1] ss:$0 sm:$0xff] (!%p139_p2) }
   0x6   : > { %142 = sbr.rel (%p139_p2) target bundleno = 26 (0x1a), region = 32  ;;  %v282_v1 = vld [vmem:[%s346_s2] ss:$0 sm:$0xff] (!%p139_p2) }
   0x7   : > { %p163_p3 = scmp.lt.s32.totalorder (!%p139_p2), %s162_s14, 17 }
   0xd   : > { %s349_s14 = smov (!%p163_p3, %s162_s14), 17 }
   0xe   : > { %s279_s15 = sshll.u32 %s349_s14, 3 }
   0xf   : > { %s166_s20 = scalar_lea.vmem %s344_s0, %s279_s15  ;;  %s172_s25 = scalar_lea.vmem %s347_s3, %s279_s15 }
  0x10   : > { %v174_v2 = vld [vmem:[%s166_s20] sm:$0xff]  ;;  %v175_v3 = vld [vmem:[%s166_s20 + $0x8] sm:$0xff]  ;;  %v176_v4 = vld [vmem:[%s166_s20 + $0x10] sm:$0xff] }
  0x11   : > { %v187_v5 = vmul.f32 %v281_v0, %v174_v2  ;;  %v188_v6 = vmul.f32 %v281_v0, %v175_v3  ;;  %v189_v7 = vmul.f32 %v281_v0, %v176_v4  ;;  %v177_v8 = vld [vmem:[%s166_s20 + $0x18] sm:$0xff]  ;;  %v178_v9 = vld [vmem:[%s166_s20 + $0x20] sm:$0xff]  ;;  %v179_v10 = vld [vmem:[%s166_s20 + $0x28] sm:$0xff] }
  0x12   : > { %v190_v11 = vmul.f32 %v281_v0, %v177_v8  ;;  %v191_v12 = vmul.f32 %v281_v0, %v178_v9  ;;  %v192_v13 = vmul.f32 %v281_v0, %v179_v10 }
  0x13   : > { %v200_v14 = vadd.f32 %v282_v1, %v187_v5  ;;  %v201_v15 = vadd.f32 %v282_v1, %v188_v6  ;;  %v202_v16 = vadd.f32 %v282_v1, %v189_v7 }
  0x14   : > { %v203_v17 = vadd.f32 %v282_v1, %v190_v11  ;;  %v204_v18 = vadd.f32 %v282_v1, %v191_v12  ;;  %v205_v19 = vadd.f32 %v282_v1, %v192_v13 }
  0x15   : > { %v206_v20 = vmax.f32 %v200_v14, 0.0  ;;  %v207_v21 = vmax.f32 %v201_v15, 0.0  ;;  %v208_v22 = vmax.f32 %v202_v16, 0.0 }
  0x16   : > { %v209_v23 = vmax.f32 %v203_v17, 0.0  ;;  %v210_v24 = vmax.f32 %v204_v18, 0.0  ;;  %v211_v25 = vmax.f32 %v205_v19, 0.0 }
  0x17   : > { %212 = vst [vmem:[%s172_s25] sm:$0xff] %v206_v20  ;;  %213 = vst [vmem:[%s172_s25 + $0x8] sm:$0xff] %v207_v21 }
  0x18   : > { %214 = vst [vmem:[%s172_s25 + $0x10] sm:$0xff] %v208_v22  ;;  %215 = vst [vmem:[%s172_s25 + $0x18] sm:$0xff] %v209_v23 }
  0x19   : > { %216 = vst [vmem:[%s172_s25 + $0x20] sm:$0xff] %v210_v24  ;;  %217 = vst [vmem:[%s172_s25 + $0x28] sm:$0xff] %v211_v25 }
  0x1a PF: > { %s13_s12 = sadd.s32 1, %s299_s12  }
  0x1b   : > { %p10_p4 = scmp.ge.s32.totalorder %s13_s12, 5  }
  0x1d   :  { %12 = sbr.rel (!%p10_p4) target bundleno = 1 (0x1), region = 62 }

// kernel: down_conv_block.2
= control target key start
LH: loop header
LB: loop body
LE: loop exit
PB: predicated region body
PF: predicated region fallthrough
CT: control target
= control target key end

     0   :  { %s2093_s21 = smov 0   ;;  %s2358_s0 = inlined_call_operand.vmem [shape: bf16[144,4], index: 0, kind: input, shape index: {}]   ;;  %s2359_s1 = inlined_call_operand.vmem [shape: bf16[144,4], index: 1, kind: input, shape index: {}]   ;;  %s2360_s2 = inlined_call_operand.vmem [shape: bf16[144,4], index: 2, kind: input, shape index: {}]   ;;  %s2361_s3 = inlined_call_operand.vmem [shape: bf16[144,4], index: 3, kind: input, shape index: {}]   ;;  %s2362_s4 = inlined_call_operand.vmem [shape: bf16[144,4], index: 4, kind: input, shape index: {}]   ;;  %s2363_s5 = inlined_call_operand.vmem [shape: bf16[144,4], index: 5, kind: input, shape index: {}]   ;;  %s2364_s6 = inlined_call_operand.vmem [shape: bf16[144,4], index: 6, kind: input, shape index: {}]   ;;  %s2365_s7 = inlined_call_operand.vmem [shape: bf16[144,4], index: 7, kind: input, shape index: {}]   ;;  %s2366_s8 = inlined_call_operand.vmem [shape: bf16[144,4], index: 8, kind: input, shape index: {}]   ;;  %s2367_s9 = inlined_call_operand.vmem [shape: bf16[9,4,128], index: 9, kind: input, shape index: {}]   ;;  %s2368_s10 = inlined_call_operand.vmem [shape: f32[1,128], index: 10, kind: input, shape index: {}]   ;;  %s2369_s11 = inlined_call_operand.vmem [shape: f32[144,128], index: 11, kind: output, shape index: {0}]   ;;  %s2370_s12 = inlined_call_operand.vmem [shape: f32[3,2,128], index: 12, kind: output, shape index: {1}]  }
   0x1 LB: > { %s2099_s22 = sadd.s32 4294967295, %s2024_s21   ;;  %p1740_p0 = scmp.ge.s32.totalorder %s2024_s21, 1  ;;  %s2024_s21 = sphi %s2093_s21, %s23_s21  }
   0x2   : > { %p454_p1 = scmp.lt.s32.totalorder %s2024_s21, 4 }
   0x4   : > { %p455_p2 = pnand %p1740_p0, %p454_p1 }
   0x5   : > { %v1752_v0 = vld [vmem:[%s2367_s9 + $0x2] sm:$0x3] (!%p455_p2)  ;;  %vm645_vm0 = vcmask (!%p455_p2), 1041408   ;;  %s540_s25 = smul.u32 (!%p455_p2), 6, %s2099_s22  ;;  %v2026_v1 = vmov (!%p455_p2), 0.0   ;;  %vm2027_vm1 = vmmov (!%p455_p2), 0  }
   0x6   : > { %458 = sbr.rel (%p455_p2) target bundleno = 360 (0x168), region = 64  ;;  %1979 = vmatprep.subr.bf16.mxu1 (!%p455_p2), %v2026_v1  ;;  %v647_v2 = vsel (!%p455_p2), %vm645_vm0, %v1752_v0, 0  ;;  %1859 = vmatprep.mubr.msk.bf16.mxu1 (!%p455_p2), %vm2027_vm1, %v2026_v1  ;;  %v611_v3 = vld [vmem:[%s2367_s9] sm:$0x3] (!%p455_p2)  ;;  %v1765_v4 = vld [vmem:[%s2367_s9 + $0x4] sm:$0x3] (!%p455_p2) }
   0x7   : > { %1980 = vmatpush3.bf16.msra.mxu1 (!%p455_p2), %v647_v2  ;;  %p541_p3 = scmp.lt.s32.totalorder (!%p455_p2), %s540_s25, 17  ;;  %1853 = vmatprep.subr.bf16.mxu0 (!%p455_p2), %v2026_v1  ;;  %vm635_vm2 = vcmask (!%p455_p2), 31744   ;;  %v731_v6 = vsel (!%p455_p2), %vm645_vm0, %v611_v3, 0  ;;  %v823_v8 = vsel (!%p455_p2), %vm645_vm0, %v1765_v4, 0  ;;  %v1779_v9 = vld [vmem:[%s2367_s9 + $0x8] sm:$0x3] (!%p455_p2) }
   0x8   : > { %1867 = vmatprep.subr.bf16.mxu1 (!%p455_p2), %v2026_v1  ;;  %1854 = vmatpush3.bf16.msra.mxu0 (!%p455_p2), %v647_v2  ;;  %v1019_v12 = vsel (!%p455_p2), %vm645_vm0, %v1779_v9, 0  ;;  %v1772_v13 = vld [vmem:[%s2367_s9 + $0x6] sm:$0x3] (!%p455_p2)  ;;  %v1793_v20 = vld [vmem:[%s2367_s9 + $0xc] sm:$0x3] (!%p455_p2)  ;;  %p600_p4 = scmp.lt.s32.totalorder (!%p455_p2), %s2099_s22, 2 }
   0x9   : > { %1855 = vmatprep.mubr.msk.bf16.mxu0 (!%p455_p2), %vm2027_vm1, %v2026_v1  ;;  %1881 = vmatprep.subr.bf16.mxu0 (!%p455_p2), %v2026_v1  ;;  %v921_v15 = vsel (!%p455_p2), %vm645_vm0, %v1772_v13, 0  ;;  %v1215_v22 = vsel (!%p455_p2), %vm645_vm0, %v1793_v20, 0  ;;  %v1786_v23 = vld [vmem:[%s2367_s9 + $0xa] sm:$0x3] (!%p455_p2)  ;;  %v1807_v30 = vld [vmem:[%s2367_s9 + $0x10] sm:$0x3] (!%p455_p2) }
   0xa   : > { %v1117_v25 = vsel (!%p455_p2), %vm645_vm0, %v1786_v23, 0  ;;  %v1411_v32 = vsel (!%p455_p2), %vm645_vm0, %v1807_v30, 0  ;;  %v1800_v33 = vld [vmem:[%s2367_s9 + $0xe] sm:$0x3] (!%p455_p2)  ;;  %vm1550_vm9 = vcmask (!%p455_p2), 1040384  }
   0xb   : > { %v1313_v35 = vsel (!%p455_p2), %vm645_vm0, %v1800_v33, 0 }
   0xd   : > { %s2372_s25 = smov (!%p541_p3, %s540_s25), 17 }
   0xe   : > { %s2122_s28 = sshll.u32 %s2372_s25, 2 }
   0xf   : > { %s550_s15 = scalar_lea.vmem %s2359_s1, %s2122_s28  ;;  %s2138_s18 = scalar_lea.vmem %s2360_s2, %s2122_s28 }
  0x10   : > { %v1991_v5 = vld [vmem:[%s550_s15 + $0x8] sm:$0xff]   ;;  %v1992_v7 = vld [vmem:[%s550_s15] sm:$0xff]   ;;  %s2145_s23 = scalar_lea.vmem %s2358_s0, %s2122_s28  ;;  %v1993_v10 = vld [vmem:[%s550_s15 + $0x10] sm:$0xff]   ;;  %s2161_s30 = scalar_lea.vmem %s2362_s4, %s2122_s28 }
  0x11   : > { %1860 = vmatmul.mubr.msk.bf16.vlgmr.msra.gmra.mrb[0].mxu1 %vm635_vm2, %v1991_v5  ;;  %1856 = vmatmul.mubr.msk.bf16.vlgmr.msra.gmra.mrb[0].mxu0 %vm635_vm2, %v1992_v7  ;;  %v1994_v11 = vld [vmem:[%s2138_s18] sm:$0xff]   ;;  %s2168_s16 = scalar_lea.vmem %s2361_s3, %s2122_s28  ;;  %s2185_s24 = scalar_lea.vmem %s2364_s6, %s2122_s28  ;;  %v1996_v16 = vld [vmem:[%s2138_s18 + $0x8] sm:$0xff]   ;;  %v1998_v18 = vld [vmem:[%s2138_s18 + $0x10] sm:$0xff]  }
  0x12   : > { %1868 = vmatpush3.bf16.msra.mxu1 %v731_v6  ;;  %1863 = vmatprep.mubr.msk.bf16.mxu1 %vm2027_vm1, %v2026_v1  ;;  %v1995_v14 = vld [vmem:[%s2145_s23] sm:$0xff]   ;;  %s2191_s29 = scalar_lea.vmem %s2363_s5, %s2122_s28  ;;  %s2204_s15 = scalar_lea.vmem %s2366_s8, %s2122_s28  ;;  %v1997_v17 = vld [vmem:[%s2145_s23 + $0x8] sm:$0xff]   ;;  %v1999_v19 = vld [vmem:[%s2145_s23 + $0x10] sm:$0xff]  }
  0x13   : > { %1882 = vmatpush3.bf16.msra.mxu0 %v823_v8  ;;  %1883 = vmatprep.mubr.msk.bf16.mxu0 %vm2027_vm1, %v2026_v1  ;;  %s2212_s20 = scalar_lea.vmem %s2365_s7, %s2122_s28  ;;  %v2000_v21 = vld [vmem:[%s2161_s30] sm:$0xff]   ;;  %v2002_v26 = vld [vmem:[%s2161_s30 + $0x8] sm:$0xff]   ;;  %v2004_v28 = vld [vmem:[%s2161_s30 + $0x10] sm:$0xff]  }
  0x14   : > { %1895 = vmatprep.subr.bf16.mxu1 %v2026_v1  ;;  %1909 = vmatprep.subr.bf16.mxu0 %v2026_v1  ;;  %v2001_v24 = vld [vmem:[%s2168_s16] sm:$0xff]   ;;  %v2003_v27 = vld [vmem:[%s2168_s16 + $0x8] sm:$0xff]   ;;  %v2005_v29 = vld [vmem:[%s2168_s16 + $0x10] sm:$0xff]   ;;  %s1502_s16 = smul.u32 48, %s2099_s22  ;;  %s2374_s22 = smov (!%p600_p4, %s2099_s22), 2 }
  0x15   : > { %v2006_v31 = vld [vmem:[%s2185_s24] sm:$0xff]   ;;  %v2008_v36 = vld [vmem:[%s2185_s24 + $0x8] sm:$0xff]   ;;  %v2010_v38 = vld [vmem:[%s2185_s24 + $0x10] sm:$0xff]   ;;  %s1750_s24 = sshll.u32 %s2372_s25, 3  ;;  %s1751_s25 = sshll.u32 %s2374_s22, 1 }
  0x16   : > { %v2007_v34 = vld [vmem:[%s2191_s29] sm:$0xff]   ;;  %v2009_v37 = vld [vmem:[%s2191_s29 + $0x8] sm:$0xff]   ;;  %v2011_v39 = vld [vmem:[%s2191_s29 + $0x10] sm:$0xff]   ;;  %s603_s28 = scalar_lea.vmem %s2370_s12, %s1751_s25 }
  0x17   : > { %v2012_v40 = vld [vmem:[%s2204_s15] sm:$0xff]   ;;  %v2014_v42 = vld [vmem:[%s2204_s15 + $0x8] sm:$0xff]   ;;  %v2016_v44 = vld [vmem:[%s2204_s15 + $0x10] sm:$0xff]  }
  0x18   : > { %v2013_v41 = vld [vmem:[%s2212_s20] sm:$0xff]   ;;  %v2015_v43 = vld [vmem:[%s2212_s20 + $0x8] sm:$0xff]   ;;  %v2017_v45 = vld [vmem:[%s2212_s20 + $0x10] sm:$0xff]   ;;  %s2330_s20 = scalar_lea.vmem %s2369_s11, %s1750_s24 }
  0x19   : > { %1864 = vmatmul.mubr.msk.bf16.gmra.mrb[4].mxu1 %vm635_vm2, %v1993_v10  ;;  %1884 = vmatmul.mubr.msk.bf16.vlgmr.msra.gmra.mrb[4].mxu0 %vm635_vm2, %v1994_v11 }
  0x1a   : > { %1869 = vmatprep.mubr.msk.bf16.mxu1 %vm2027_vm1, %v2026_v1  ;;  %1910 = vmatpush3.bf16.msra.mxu0 %v1019_v12 }
  0x1b   : > { %1887 = vmatprep.mubr.msk.bf16.mxu0 %vm2027_vm1, %v2026_v1  ;;  %1937 = vmatprep.subr.bf16.mxu0 %v2026_v1 }
  0x21   : > { %1870 = vmatmul.mubr.msk.bf16.vlgmr.msra.gmra.mrb[8].mxu1 %vm635_vm2, %v1995_v14  ;;  %1888 = vmatmul.mubr.msk.bf16.gmra.mrb[8].mxu0 %vm635_vm2, %v1996_v16 }
  0x22   : > { %1896 = vmatpush3.bf16.msra.mxu1 %v921_v15  ;;  %1873 = vmatprep.mubr.msk.bf16.mxu1 %vm2027_vm1, %v2026_v1 }
  0x23   : > { %1923 = vmatprep.subr.bf16.mxu1 %v2026_v1  ;;  %1891 = vmatprep.mubr.msk.bf16.mxu0 %vm2027_vm1, %v2026_v1 }
  0x29   : > { %1874 = vmatmul.mubr.msk.bf16.gmra.mrb[12].mxu1 %vm635_vm2, %v1997_v17  ;;  %1892 = vmatmul.mubr.msk.bf16.gmra.mrb[12].mxu0 %vm635_vm2, %v1998_v18 }
  0x2a   : > { %1877 = vmatprep.mubr.msk.bf16.mxu1 %vm2027_vm1, %v2026_v1  ;;  %1911 = vmatprep.mubr.msk.bf16.mxu0 %vm2027_vm1, %v2026_v1 }
  0x31   : > { %1878 = vmatmul.mubr.msk.bf16.gmra.mrb[16].mxu1 %vm635_vm2, %v1999_v19  ;;  %1912 = vmatmul.mubr.msk.bf16.vlgmr.msra.gmra.mrb[16].mxu0 %vm635_vm2, %v2000_v21 }
  0x32   : > { %1897 = vmatprep.mubr.msk.bf16.mxu1 %vm2027_vm1, %v2026_v1  ;;  %1938 = vmatpush3.bf16.msra.mxu0 %v1215_v22 }
  0x33   : > { %1915 = vmatprep.mubr.msk.bf16.mxu0 %vm2027_vm1, %v2026_v1  ;;  %1965 = vmatprep.subr.bf16.mxu0 %v2026_v1 }
  0x39   : > { %1898 = vmatmul.mubr.msk.bf16.vlgmr.msra.gmra.mrb[20].mxu1 %vm635_vm2, %v2001_v24  ;;  %1916 = vmatmul.mubr.msk.bf16.gmra.mrb[20].mxu0 %vm635_vm2, %v2002_v26 }
  0x3a   : > { %1924 = vmatpush3.bf16.msra.mxu1 %v1117_v25  ;;  %1901 = vmatprep.mubr.msk.bf16.mxu1 %vm2027_vm1, %v2026_v1 }
  0x3b   : > { %1951 = vmatprep.subr.bf16.mxu1 %v2026_v1  ;;  %1919 = vmatprep.mubr.msk.bf16.mxu0 %vm2027_vm1, %v2026_v1 }
  0x41   : > { %1902 = vmatmul.mubr.msk.bf16.gmra.mrb[24].mxu1 %vm635_vm2, %v2003_v27  ;;  %1920 = vmatmul.mubr.msk.bf16.gmra.mrb[24].mxu0 %vm635_vm2, %v2004_v28 }
  0x42   : > { %1905 = vmatprep.mubr.msk.bf16.mxu1 %vm2027_vm1, %v2026_v1  ;;  %1939 = vmatprep.mubr.msk.bf16.mxu0 %vm2027_vm1, %v2026_v1 }
  0x49   : > { %1906 = vmatmul.mubr.msk.bf16.gmra.mrb[28].mxu1 %vm635_vm2, %v2005_v29  ;;  %1940 = vmatmul.mubr.msk.bf16.vlgmr.msra.gmra.mrb[28].mxu0 %vm635_vm2, %v2006_v31 }
  0x4a   : > { %1925 = vmatprep.mubr.msk.bf16.mxu1 %vm2027_vm1, %v2026_v1  ;;  %1966 = vmatpush3.bf16.msra.mxu0 %v1411_v32 }
  0x4b   : > { %1943 = vmatprep.mubr.msk.bf16.mxu0 %vm2027_vm1, %v2026_v1 }
  0x51   : > { %1926 = vmatmul.mubr.msk.bf16.vlgmr.msra.gmra.mrb[32].mxu1 %vm635_vm2, %v2007_v34  ;;  %1944 = vmatmul.mubr.msk.bf16.gmra.mrb[32].mxu0 %vm635_vm2, %v2008_v36 }
  0x52   : > { %1952 = vmatpush3.bf16.msra.mxu1 %v1313_v35  ;;  %1929 = vmatprep.mubr.msk.bf16.mxu1 %vm2027_vm1, %v2026_v1 }
  0x53   : > { %1947 = vmatprep.mubr.msk.bf16.mxu0 %vm2027_vm1, %v2026_v1 }
  0x59   : > { %1930 = vmatmul.mubr.msk.bf16.gmra.mrb[36].mxu1 %vm635_vm2, %v2009_v37  ;;  %1948 = vmatmul.mubr.msk.bf16.gmra.mrb[36].mxu0 %vm635_vm2, %v2010_v38 }
  0x5a   : > { %1933 = vmatprep.mubr.msk.bf16.mxu1 %vm2027_vm1, %v2026_v1  ;;  %1967 = vmatprep.mubr.msk.bf16.mxu0 %vm2027_vm1, %v2026_v1 }
  0x61   : > { %1934 = vmatmul.mubr.msk.bf16.gmra.mrb[40].mxu1 %vm635_vm2, %v2011_v39  ;;  %1968 = vmatmul.mubr.msk.bf16.vlgmr.msra.gmra.mrb[40].mxu0 %vm635_vm2, %v2012_v40 }
  0x62   : > { %1953 = vmatprep.mubr.msk.bf16.mxu1 %vm2027_vm1, %v2026_v1  ;;  %1971 = vmatprep.mubr.msk.bf16.mxu0 %vm2027_vm1, %v2026_v1 }
  0x69   : > { %1954 = vmatmul.mubr.msk.bf16.vlgmr.msra.gmra.mrb[44].mxu1 %vm635_vm2, %v2013_v41  ;;  %1972 = vmatmul.mubr.msk.bf16.gmra.mrb[44].mxu0 %vm635_vm2, %v2014_v42 }
  0x6a   : > { %1957 = vmatprep.mubr.msk.bf16.mxu1 %vm2027_vm1, %v2026_v1  ;;  %1975 = vmatprep.mubr.msk.bf16.mxu0 %vm2027_vm1, %v2026_v1 }
  0x71   : > { %1958 = vmatmul.mubr.msk.bf16.gmra.mrb[48].mxu1 %vm635_vm2, %v2015_v43  ;;  %1976 = vmatmul.mubr.msk.bf16.gmra.mrb[48].mxu0 %vm635_vm2, %v2016_v44 }
  0x72   : > { %1961 = vmatprep.mubr.msk.bf16.mxu1 %vm2027_vm1, %v2026_v1 }
  0x79   : > { %1962 = vmatmul.mubr.msk.bf16.gmra.mrb[52].mxu1 %vm635_vm2, %v2017_v45 }
  0xe4   : > { %v691_v46 = vpop.f32.mrb[0].mxu1  ;;  %v683_v48 = vpop.f32.mrb[0].mxu0 }
  0xe5   : > { %v1861_v47 = vpop.f32.mrb[1].mxu1  ;;  %v1857_v50 = vpop.f32.mrb[1].mxu0 }
  0xe6   : > { %v694_v49 = vpop.f32.mrb[2].mxu1  ;;  %v686_v52 = vpop.f32.mrb[2].mxu0 }
  0xe7   : > { %v1862_v51 = vpop.f32.mrb[3].mxu1  ;;  %v1858_v53 = vpop.f32.mrb[3].mxu0 }
  0xec   : > { %v699_v54 = vpop.f32.mrb[4].mxu1  ;;  %v859_v56 = vpop.f32.mrb[4].mxu0 }
  0xed   : > { %v1865_v55 = vpop.f32.mrb[5].mxu1  ;;  %v1885_v58 = vpop.f32.mrb[5].mxu0 }
  0xee   : > { %v702_v57 = vpop.f32.mrb[6].mxu1  ;;  %v862_v60 = vpop.f32.mrb[6].mxu0 }
  0xef   : > { %v1866_v59 = vpop.f32.mrb[7].mxu1  ;;  %v1886_v61 = vpop.f32.mrb[7].mxu0 }
  0xf4   : > { %v767_v62 = vpop.f32.mrb[8].mxu1  ;;  %v867_v2 = vpop.f32.mrb[8].mxu0 }
  0xf5   : > { %v768_v63 = vadd.f32 %v767_v62, %v683_v48  ;;  %v1871_v0 = vpop.f32.mrb[9].mxu1  ;;  %v1889_v5 = vpop.f32.mrb[9].mxu0 }
  0xf6   : > { %v770_v1 = vpop.f32.mrb[10].mxu1  ;;  %v870_v7 = vpop.f32.mrb[10].mxu0 }
  0xf7   : > { %v771_v3 = vadd.f32 %v770_v1, %v686_v52  ;;  %v1872_v4 = vpop.f32.mrb[11].mxu1  ;;  %v882_v6 = vadd.f32 %v859_v56, %v768_v63  ;;  %v1890_v8 = vpop.f32.mrb[11].mxu0 }
  0xf9   : > { %v883_v9 = vadd.f32 %v862_v60, %v771_v3 }
  0xfc   : > { %v775_v10 = vpop.f32.mrb[12].mxu1  ;;  %v875_v14 = vpop.f32.mrb[12].mxu0 }
  0xfd   : > { %v776_v11 = vadd.f32 %v775_v10, %v691_v46  ;;  %v1875_v12 = vpop.f32.mrb[13].mxu1  ;;  %v1893_v17 = vpop.f32.mrb[13].mxu0 }
  0xfe   : > { %v778_v13 = vpop.f32.mrb[14].mxu1  ;;  %v878_v19 = vpop.f32.mrb[14].mxu0 }
  0xff   : > { %v779_v15 = vadd.f32 %v778_v13, %v694_v49  ;;  %v1876_v16 = vpop.f32.mrb[15].mxu1  ;;  %v884_v18 = vadd.f32 %v867_v2, %v776_v11  ;;  %v1894_v20 = vpop.f32.mrb[15].mxu0 }
 0x101   : > { %v885_v21 = vadd.f32 %v870_v7, %v779_v15 }
 0x104   : > { %v783_v22 = vpop.f32.mrb[16].mxu1  ;;  %v1055_v26 = vpop.f32.mrb[16].mxu0 }
 0x105   : > { %v784_v23 = vadd.f32 %v783_v22, %v699_v54  ;;  %v1879_v24 = vpop.f32.mrb[17].mxu1  ;;  %v1913_v29 = vpop.f32.mrb[17].mxu0 }
 0x106   : > { %v786_v25 = vpop.f32.mrb[18].mxu1  ;;  %v1058_v31 = vpop.f32.mrb[18].mxu0 }
 0x107   : > { %v787_v27 = vadd.f32 %v786_v25, %v702_v57  ;;  %v1880_v28 = vpop.f32.mrb[19].mxu1  ;;  %v886_v30 = vadd.f32 %v875_v14, %v784_v23  ;;  %v1914_v32 = vpop.f32.mrb[19].mxu0 }
 0x109   : > { %v887_v33 = vadd.f32 %v878_v19, %v787_v27 }
 0x10c   : > { %v957_v34 = vpop.f32.mrb[20].mxu1  ;;  %v1063_v38 = vpop.f32.mrb[20].mxu0 }
 0x10d   : > { %v980_v35 = vadd.f32 %v957_v34, %v882_v6  ;;  %v1899_v36 = vpop.f32.mrb[21].mxu1  ;;  %v1917_v41 = vpop.f32.mrb[21].mxu0 }
 0x10e   : > { %v960_v37 = vpop.f32.mrb[22].mxu1  ;;  %v1066_v43 = vpop.f32.mrb[22].mxu0 }
 0x10f   : > { %v981_v39 = vadd.f32 %v960_v37, %v883_v9  ;;  %v1900_v40 = vpop.f32.mrb[23].mxu1  ;;  %v1078_v42 = vadd.f32 %v1055_v26, %v980_v35  ;;  %v1918_v44 = vpop.f32.mrb[23].mxu0 }
 0x111   : > { %v1079_v45 = vadd.f32 %v1058_v31, %v981_v39 }
 0x114   : > { %v965_v46 = vpop.f32.mrb[24].mxu1  ;;  %v1071_v50 = vpop.f32.mrb[24].mxu0 }
 0x115   : > { %v982_v47 = vadd.f32 %v965_v46, %v884_v18  ;;  %v1903_v48 = vpop.f32.mrb[25].mxu1  ;;  %v1921_v53 = vpop.f32.mrb[25].mxu0 }
 0x116   : > { %v968_v49 = vpop.f32.mrb[26].mxu1  ;;  %v1074_v55 = vpop.f32.mrb[26].mxu0 }
 0x117   : > { %v983_v51 = vadd.f32 %v968_v49, %v885_v21  ;;  %v1904_v52 = vpop.f32.mrb[27].mxu1  ;;  %v1080_v54 = vadd.f32 %v1063_v38, %v982_v47  ;;  %v1922_v56 = vpop.f32.mrb[27].mxu0 }
 0x119   : > { %v1081_v57 = vadd.f32 %v1066_v43, %v983_v51 }
 0x11c   : > { %v973_v58 = vpop.f32.mrb[28].mxu1  ;;  %v1251_v62 = vpop.f32.mrb[28].mxu0 }
 0x11d   : > { %v984_v59 = vadd.f32 %v973_v58, %v886_v30  ;;  %v1907_v60 = vpop.f32.mrb[29].mxu1  ;;  %v1941_v1 = vpop.f32.mrb[29].mxu0  ;;  %v1495_v30 = vlaneseq }
 0x11e   : > { %v976_v61 = vpop.f32.mrb[30].mxu1  ;;  %v1254_v3 = vpop.f32.mrb[30].mxu0 }
 0x11f   : > { %v985_v63 = vadd.f32 %v976_v61, %v887_v33  ;;  %v1908_v0 = vpop.f32.mrb[31].mxu1  ;;  %v1082_v2 = vadd.f32 %v1071_v50, %v984_v59  ;;  %v1942_v4 = vpop.f32.mrb[31].mxu0  ;;  %v1496_v36 = vshrl.u32 %v1495_v30, 7  ;;  %v2324_v50 = vld [vmem:[%s2368_s10] ss:$0 sm:$0xff] }
 0x121   : > { %v1083_v5 = vadd.f32 %v1074_v55, %v985_v63  ;;  %v1498_v58 = vadd.s32 16, %v1496_v36  ;;  %v1499_v63 = vadd.s32 24, %v1496_v36 }
 0x124   : > { %v1153_v6 = vpop.f32.mrb[32].mxu1  ;;  %v1259_v10 = vpop.f32.mrb[32].mxu0 }
 0x125   : > { %v1176_v7 = vadd.f32 %v1153_v6, %v1078_v42  ;;  %v1927_v8 = vpop.f32.mrb[33].mxu1  ;;  %v1945_v13 = vpop.f32.mrb[33].mxu0  ;;  %v2315_v42 = vstv %s1502_s16 }
 0x126   : > { %v1156_v9 = vpop.f32.mrb[34].mxu1  ;;  %v1262_v15 = vpop.f32.mrb[34].mxu0  ;;  %v1504_v47 = vadd.s32 %v2315_v42, %v1496_v36 }
 0x127   : > { %v1177_v11 = vadd.f32 %v1156_v9, %v1079_v45  ;;  %v1928_v12 = vpop.f32.mrb[35].mxu1  ;;  %v1274_v14 = vadd.f32 %v1251_v62, %v1176_v7  ;;  %v1946_v16 = vpop.f32.mrb[35].mxu0  ;;  %v1497_v45 = vadd.s32 8, %v1496_v36 }
 0x128   : > { %vm1510_vm3 = vcmp.lt.s32.totalorder %v1504_v47, 128 }
 0x129   : > { %v1275_v17 = vadd.f32 %v1254_v3, %v1177_v11  ;;  %v1505_v52 = vadd.s32 %v2315_v42, %v1497_v45  ;;  %v1506_v3 = vadd.s32 %v2315_v42, %v1498_v58  ;;  %v1507_v11 = vadd.s32 %v2315_v42, %v1499_v63 }
 0x12b   : > { %vm1511_vm4 = vcmp.lt.s32.totalorder %v1505_v52, 128  ;;  %vm1512_vm5 = vcmp.lt.s32.totalorder %v1506_v3, 128  ;;  %vm1513_vm6 = vcmp.lt.s32.totalorder %v1507_v11, 128 }
 0x12c   : > { %v1161_v18 = vpop.f32.mrb[36].mxu1  ;;  %v1267_v22 = vpop.f32.mrb[36].mxu0 }
 0x12d   : > { %v1178_v19 = vadd.f32 %v1161_v18, %v1080_v54  ;;  %v1931_v20 = vpop.f32.mrb[37].mxu1  ;;  %v1949_v25 = vpop.f32.mrb[37].mxu0  ;;  %v1500_v18 = vadd.s32 32, %v1496_v36 }
 0x12e   : > { %v1164_v21 = vpop.f32.mrb[38].mxu1  ;;  %v1270_v27 = vpop.f32.mrb[38].mxu0 }
 0x12f   : > { %v1179_v23 = vadd.f32 %v1164_v21, %v1081_v57  ;;  %v1932_v24 = vpop.f32.mrb[39].mxu1  ;;  %v1276_v26 = vadd.f32 %v1259_v10, %v1178_v19  ;;  %v1950_v28 = vpop.f32.mrb[39].mxu0 }
 0x131   : > { %v1277_v29 = vadd.f32 %v1262_v15, %v1179_v23  ;;  %v1501_v23 = vadd.s32 40, %v1496_v36 }
 0x134   : > { %v1169_v31 = vpop.f32.mrb[40].mxu1  ;;  %v1447_v35 = vpop.f32.mrb[40].mxu0 }
 0x135   : > { %v1180_v32 = vadd.f32 %v1169_v31, %v1082_v2  ;;  %v1935_v33 = vpop.f32.mrb[41].mxu1  ;;  %v1969_v39 = vpop.f32.mrb[41].mxu0 }
 0x136   : > { %v1172_v34 = vpop.f32.mrb[42].mxu1  ;;  %v1450_v41 = vpop.f32.mrb[42].mxu0 }
 0x137   : > { %v1181_v37 = vadd.f32 %v1172_v34, %v1083_v5  ;;  %v1936_v38 = vpop.f32.mrb[43].mxu1  ;;  %v2313_v40 = vadd.f32 %v1267_v22, %v1180_v32  ;;  %v1970_v43 = vpop.f32.mrb[43].mxu0 }
 0x139   : > { %v2317_v44 = vadd.f32 %v1270_v27, %v1181_v37  ;;  %v1509_v37 = vadd.s32 %v2315_v42, %v1501_v23 }
 0x13b   : > { %vm1515_vm8 = vcmp.lt.s32.totalorder %v1509_v37, 128 }
 0x13c   : > { %v1349_v46 = vpop.f32.mrb[44].mxu1  ;;  %v1455_v53 = vpop.f32.mrb[44].mxu0 }
 0x13d   : > { %v1372_v48 = vadd.f32 %v1349_v46, %v1274_v14  ;;  %v1955_v49 = vpop.f32.mrb[45].mxu1  ;;  %v1973_v57 = vpop.f32.mrb[45].mxu0 }
 0x13e   : > { %v1352_v51 = vpop.f32.mrb[46].mxu1  ;;  %v1458_v59 = vpop.f32.mrb[46].mxu0 }
 0x13f   : > { %v1470_v54 = vadd.f32 %v1447_v35, %v1372_v48  ;;  %v1373_v55 = vadd.f32 %v1352_v51, %v1275_v17  ;;  %v1956_v56 = vpop.f32.mrb[47].mxu1  ;;  %v1974_v62 = vpop.f32.mrb[47].mxu0 }
 0x141   : > { %v1483_v60 = vadd.f32 %v2324_v50, %v1470_v54  ;;  %v1471_v61 = vadd.f32 %v1450_v41, %v1373_v55 }
 0x143   : > { %1489 = vst [vmem:[%s2330_s20] sm:$0xff] %v1483_v60  ;;  %v1516_v0 = vsel %vm1510_vm3, %v1483_v60, 0.0  ;;  %v1484_v1 = vadd.f32 %v2324_v50, %v1471_v61 }
 0x144   : > { %v1357_v2 = vpop.f32.mrb[48].mxu1  ;;  %v1533_v7 = vmul.f32 %v1516_v0, %v1516_v0  ;;  %v1463_v12 = vpop.f32.mrb[48].mxu0 }
 0x145   : > { %1490 = vst [vmem:[%s2330_s20 + $0x8] sm:$0xff] %v1484_v1  ;;  %v1517_v4 = vsel %vm1511_vm4, %v1484_v1, 0.0  ;;  %v1374_v5 = vadd.f32 %v1357_v2, %v1276_v26  ;;  %v1959_v6 = vpop.f32.mrb[49].mxu1  ;;  %v1977_v16 = vpop.f32.mrb[49].mxu0 }
 0x146   : > { %v1522_v8 = vadd.f32 %v1517_v4, %v1516_v0  ;;  %v1534_v9 = vmul.f32 %v1517_v4, %v1517_v4  ;;  %v1360_v10 = vpop.f32.mrb[50].mxu1  ;;  %v1466_v19 = vpop.f32.mrb[50].mxu0 }
 0x147   : > { %v1472_v13 = vadd.f32 %v1455_v53, %v1374_v5  ;;  %v1375_v14 = vadd.f32 %v1360_v10, %v1277_v29  ;;  %v1960_v15 = vpop.f32.mrb[51].mxu1  ;;  %v1978_v22 = vpop.f32.mrb[51].mxu0  ;;  %v1508_v29 = vadd.s32 %v2315_v42, %v1500_v18 }
 0x148   : > { %v1539_v17 = vadd.f32 %v1534_v9, %v1533_v7 }
 0x149   : > { %v1485_v20 = vadd.f32 %v2324_v50, %v1472_v13  ;;  %v1473_v21 = vadd.f32 %v1458_v59, %v1375_v14  ;;  %vm1514_vm7 = vcmp.lt.s32.totalorder %v1508_v29, 128 }
 0x14b   : > { %1491 = vst [vmem:[%s2330_s20 + $0x10] sm:$0xff] %v1485_v20  ;;  %v1518_v24 = vsel %vm1512_vm5, %v1485_v20, 0.0  ;;  %v1486_v25 = vadd.f32 %v2324_v50, %v1473_v21 }
 0x14c   : > { %v1523_v26 = vadd.f32 %v1522_v8, %v1518_v24  ;;  %v1535_v27 = vmul.f32 %v1518_v24, %v1518_v24  ;;  %v1365_v28 = vpop.f32.mrb[52].mxu1 }
 0x14d   : > { %1492 = vst [vmem:[%s2330_s20 + $0x18] sm:$0xff] %v1486_v25  ;;  %v1519_v30 = vsel %vm1513_vm6, %v1486_v25, 0.0  ;;  %v1376_v31 = vadd.f32 %v1365_v28, %v2313_v40  ;;  %v1963_v32 = vpop.f32.mrb[53].mxu1 }
 0x14e   : > { %v1540_v33 = vadd.f32 %v1539_v17, %v1535_v27  ;;  %v1524_v34 = vadd.f32 %v1523_v26, %v1519_v30  ;;  %v1536_v35 = vmul.f32 %v1519_v30, %v1519_v30  ;;  %v1368_v36 = vpop.f32.mrb[54].mxu1 }
 0x14f   : > { %v1474_v38 = vadd.f32 %v1463_v12, %v1376_v31  ;;  %v1377_v39 = vadd.f32 %v1368_v36, %v2317_v44  ;;  %v1964_v41 = vpop.f32.mrb[55].mxu1 }
 0x150   : > { %v1541_v43 = vadd.f32 %v1540_v33, %v1536_v35 }
 0x151   : > { %v1487_v45 = vadd.f32 %v2324_v50, %v1474_v38  ;;  %v1475_v46 = vadd.f32 %v1466_v19, %v1377_v39 }
 0x153   : > { %1493 = vst [vmem:[%s2330_s20 + $0x20] sm:$0xff] %v1487_v45  ;;  %v1520_v40 = vsel %vm1514_vm7, %v1487_v45, 0.0  ;;  %v1488_v47 = vadd.f32 %v2324_v50, %v1475_v46 }
 0x154   : > { %v1525_v48 = vadd.f32 %v1524_v34, %v1520_v40  ;;  %v1537_v49 = vmul.f32 %v1520_v40, %v1520_v40 }
 0x155   : > { %1494 = vst [vmem:[%s2330_s20 + $0x28] sm:$0xff] %v1488_v47  ;;  %v1521_v42 = vsel %vm1515_vm8, %v1488_v47, 0.0 }
 0x156   : > { %v1542_v51 = vadd.f32 %v1541_v43, %v1537_v49  ;;  %v1526_v52 = vadd.f32 %v1525_v48, %v1521_v42  ;;  %v1538_v44 = vmul.f32 %v1521_v42, %v1521_v42 }
 0x158   : > { %v1527_v53 = vrot.slane %v1526_v52, 4  ;;  %v1543_v54 = vadd.f32 %v1542_v51, %v1538_v44 }
 0x15a   : > { %v1528_v55 = vadd.f32 %v1527_v53, %v1526_v52  ;;  %v1544_v56 = vrot.slane %v1543_v54, 4 }
 0x15c   : > { %v1529_v57 = vrot.slane %v1528_v55, 2  ;;  %v1545_v58 = vadd.f32 %v1544_v56, %v1543_v54 }
 0x15e   : > { %v1530_v59 = vadd.f32 %v1529_v57, %v1528_v55  ;;  %v1546_v60 = vrot.slane %v1545_v58, 2 }
 0x160   : > { %v1531_v61 = vrot.slane %v1530_v59, 1  ;;  %v1547_v62 = vadd.f32 %v1546_v60, %v1545_v58 }
 0x162   : > { %v1548_v50 = vrot.slane %v1547_v62, 1  ;;  %v1532_v63 = vadd.f32 %v1531_v61, %v1530_v59 }
 0x164   : > { %v1549_v0 = vadd.f32 %v1548_v50, %v1547_v62 }
 0x166   : > { %v1551_v1 = vsel %vm1550_vm9, %v1532_v63, %v1549_v0 }
 0x167   : > { %1552 = vst [vmem:[%s603_s28] sm:$0x3] %v1551_v1 }
 0x168 PF: > { %s23_s21 = sadd.s32 1, %s2024_s21  }
 0x169   : > { %p20_p5 = scmp.ge.s32.totalorder %s23_s21, 5  }
 0x16b   :  { %22 = sbr.rel (!%p20_p5) target bundleno = 1 (0x1), region = 138 }

</bundles_post_ra>
